<compile_context>
chip_gen: v5e
topology: v5e:2x2
jax: 0.10.0
libtpu: 0.0.40
codegen_flags: <defaults>
</compile_context>

<pallas_src>
import jax
import jax.numpy as jnp
from jax.experimental import pallas as pl
from jax.experimental.pallas import tpu as pltpu


def _bagging_kernel(x_ref, w_ref, b_ref, o_ref):
    # x_ref: (B, IN)
    # w_ref: (M, IN, OUT)  per-model weights
    # b_ref: (M, OUT)      per-model biases
    # o_ref: (B, OUT)
    n_models = w_ref.shape[0]  # static Python int
    inv_m = 1.0 / n_models

    # mean_m W_m : cheap VPU reduce over the M leading slabs (no MXU cost).
    w_mean = jnp.sum(w_ref[...].astype(jnp.float32), axis=0) * inv_m
    # mean_m b_m : (1, OUT), broadcast over batch rows by the VPU.
    b_mean = jnp.sum(b_ref[...].astype(jnp.float32), axis=0, keepdims=True) * inv_m

    # Single MXU pass: x @ mean_m(W_m), f32 accumulation.
    y = jnp.dot(x_ref[...].astype(jnp.float32), w_mean,
                preferred_element_type=jnp.float32)

    o_ref[...] = (y + b_mean).astype(o_ref.dtype)


def bagging_forward(x, weights, biases):
    """x: (B, IN), weights: (M, IN, OUT), biases: (M, OUT) -> (B, OUT).

    Equivalent to mean_m(x @ weights[m] + biases[m]).
    """
    n_models, in_f, out_f = weights.shape
    batch = x.shape[0]

    return pl.pallas_call(
        _bagging_kernel,
        out_shape=jax.ShapeDtypeStruct((batch, out_f), x.dtype),
        grid_spec=pltpu.PrefetchScalarGridSpec(
            num_scalar_prefetch=0,
            grid=(1,),
            in_specs=[
                pl.BlockSpec((batch, in_f), lambda i: (0, 0)),
                pl.BlockSpec((n_models, in_f, out_f), lambda i: (0, 0, 0)),
                pl.BlockSpec((n_models, out_f), lambda i: (0, 0)),
            ],
            out_specs=pl.BlockSpec((batch, out_f), lambda i: (0, 0)),
        ),
        compiler_params=pltpu.CompilerParams(
            dimension_semantics=("arbitrary",),
        ),
    )(x, weights, biases)


if __name__ == "__main__":
    B, IN_F, OUT_F, N_MODELS = 8, 32, 32, 4

    key = jax.random.PRNGKey(0)
    kx, kw, kb = jax.random.split(key, 3)

    x = jax.random.normal(kx, (B, IN_F), dtype=jnp.float32)
    # PyTorch Linear-style init: uniform(-1/sqrt(IN), 1/sqrt(IN))
    bound = 1.0 / (IN_F ** 0.5)
    weights = jax.random.uniform(
        kw, (N_MODELS, IN_F, OUT_F), minval=-bound, maxval=bound, dtype=jnp.float32
    )
    biases = jax.random.uniform(
        kb, (N_MODELS, OUT_F), minval=-bound, maxval=bound, dtype=jnp.float32
    )

    out = bagging_forward(x, weights, biases)
    out = jax.block_until_ready(out)

    # Pure-JAX reference: mean over per-model linear outputs.
    ref = jnp.mean(
        jnp.einsum("bi,mio->mbo", x, weights) + biases[:, None, :], axis=0
    )
    assert out.shape == (B, OUT_F)
    assert jnp.allclose(out, ref, atol=1e-5, rtol=1e-5)

    print("KERNEL_OK")
</pallas_src>

<mosaic_0001>
module attributes {stable_mosaic.version = 11 : i64} {
  func.func @_bagging_kernel(%arg0: i32, %arg1: memref<8x32xf32, #tpu.memory_space<vmem>>, %arg2: memref<4x32x32xf32, #tpu.memory_space<vmem>>, %arg3: memref<4x32xf32, #tpu.memory_space<vmem>>, %arg4: memref<8x32xf32, #tpu.memory_space<vmem>>) attributes {dimension_semantics = [#tpu.dimension_semantics<arbitrary>], iteration_bounds = array<i64: 1>, scalar_prefetch = 0 : i64, scratch_operands = 0 : i64, tpu.core_type = #tpu.core_type<tc>, window_params = [{pipeline_mode = #tpu.pipeline_mode<synchronous>, transform_indices = @transform_0, window_bounds = array<i64: 8, 32>}, {pipeline_mode = #tpu.pipeline_mode<synchronous>, transform_indices = @transform_1, window_bounds = array<i64: 4, 32, 32>}, {pipeline_mode = #tpu.pipeline_mode<synchronous>, transform_indices = @transform_2, window_bounds = array<i64: 4, 32>}, {pipeline_mode = #tpu.pipeline_mode<synchronous>, transform_indices = @transform_3, window_bounds = array<i64: 8, 32>}]} {
    %c0 = arith.constant 0 : index
    %c0_0 = arith.constant 0 : index
    %c0_1 = arith.constant 0 : index
    %0 = vector.load %arg2[%c0, %c0_0, %c0_1] : memref<4x32x32xf32, #tpu.memory_space<vmem>>, vector<4x32x32xf32>
    %cst = arith.constant dense<0.000000e+00> : vector<32x32xf32>
    %1 = vector.multi_reduction <add>, %0, %cst [0] : vector<4x32x32xf32> to vector<32x32xf32>
    %cst_2 = arith.constant 2.500000e-01 : f32
    %2 = vector.broadcast %cst_2 : f32 to vector<32x32xf32>
    %3 = arith.mulf %1, %2 : vector<32x32xf32>
    %c0_3 = arith.constant 0 : index
    %c0_4 = arith.constant 0 : index
    %4 = vector.load %arg3[%c0_3, %c0_4] : memref<4x32xf32, #tpu.memory_space<vmem>>, vector<4x32xf32>
    %cst_5 = arith.constant dense<0.000000e+00> : vector<32xf32>
    %5 = vector.multi_reduction <add>, %4, %cst_5 [0] : vector<4x32xf32> to vector<32xf32>
    %6 = vector.shape_cast %5 : vector<32xf32> to vector<1x32xf32>
    %cst_6 = arith.constant 2.500000e-01 : f32
    %7 = vector.broadcast %cst_6 : f32 to vector<1x32xf32>
    %8 = arith.mulf %6, %7 : vector<1x32xf32>
    %c0_7 = arith.constant 0 : index
    %c0_8 = arith.constant 0 : index
    %9 = vector.load %arg1[%c0_7, %c0_8] : memref<8x32xf32, #tpu.memory_space<vmem>>, vector<8x32xf32>
    %cst_9 = arith.constant dense<0.000000e+00> : vector<8x32xf32>
    %10 = tpu.matmul %9, %3, %cst_9 {dimension_numbers = #tpu.dot_dimension_numbers<[1], [0], [0], [1], [0, 0, 1, 1], [], []>} : vector<8x32xf32>, vector<32x32xf32>, vector<8x32xf32> -> vector<8x32xf32>
    %11 = vector.broadcast %8 : vector<1x32xf32> to vector<8x32xf32>
    %12 = arith.addf %10, %11 : vector<8x32xf32>
    %c0_10 = arith.constant 0 : index
    %c0_11 = arith.constant 0 : index
    %13 = vector.load %arg4[%c0_10, %c0_11] : memref<8x32xf32, #tpu.memory_space<vmem>>, vector<8x32xf32>
    tpu.vector_store %arg4[%c0_10, %c0_11], %12 {strides = array<i32>} : memref<8x32xf32, #tpu.memory_space<vmem>>, vector<8x32xf32>,
    return
  }
  func.func @transform_0(%arg0: i32) -> (i32, i32) {
    %c0_i32 = arith.constant 0 : i32
    %c0_i32_0 = arith.constant 0 : i32
    %c0_i32_1 = arith.constant 0 : i32
    return %c0_i32, %c0_i32_0 : i32, i32
  }
  func.func @transform_1(%arg0: i32) -> (i32, i32, i32) {
    %c0_i32 = arith.constant 0 : i32
    %c0_i32_0 = arith.constant 0 : i32
    %c0_i32_1 = arith.constant 0 : i32
    %c0_i32_2 = arith.constant 0 : i32
    return %c0_i32, %c0_i32_0, %c0_i32_1 : i32, i32, i32
  }
  func.func @transform_2(%arg0: i32) -> (i32, i32) {
    %c0_i32 = arith.constant 0 : i32
    %c0_i32_0 = arith.constant 0 : i32
    %c0_i32_1 = arith.constant 0 : i32
    return %c0_i32, %c0_i32_0 : i32, i32
  }
  func.func @transform_3(%arg0: i32) -> (i32, i32) {
    %c0_i32 = arith.constant 0 : i32
    %c0_i32_0 = arith.constant 0 : i32
    %c0_i32_1 = arith.constant 0 : i32
    return %c0_i32, %c0_i32_0 : i32, i32
  }
}

</mosaic_0001>

<bundles_post_ra>
// kernel: tpu_custom_call.1
= control target key start
LH: loop header
LB: loop body
LE: loop exit
PB: predicated region body
PF: predicated region fallthrough
CT: control target
= control target key end

     0   :  { %8 = vsyncpa [#allocation3], 0  ;;  %s325_s0 = inlined_call_operand.hbm [shape: f32[8,32], index: 0, kind: input, shape index: {}]   ;;  %s326_s1 = inlined_call_operand.hbm [shape: f32[4,32,32], index: 1, kind: input, shape index: {}]   ;;  %s327_s2 = inlined_call_operand.hbm [shape: f32[4,32], index: 2, kind: input, shape index: {}]   ;;  %s328_s3 = inlined_call_operand.hbm [shape: f32[8,32], index: 3, kind: output, shape index: {}]  }
   0x1   :  { %9 = vsyncpa [#allocation6], 0  ;;  %s26_s14 = sshll.u32 %s326_s1, 4  ;;  %s27_s14 = int_to_ptr.hbm [resolvable:$true] %s26_s14 }
   0x2   :  { %10 = vsyncpa [#allocation4], 0  ;;  %s269_s15 = smov [#allocation5]   ;;  %s16_s19 = sshll.u32 %s325_s0, 4  ;;  %s17_s19 = int_to_ptr.hbm [resolvable:$true] %s16_s19 }
   0x3   :  { %s28_s16 = sshll.u32 %s269_s15, 4  ;;  %s270_s20 = smov 128   ;;  %s29_s16 = int_to_ptr.vmem [resolvable:$true] %s28_s16 }
   0x4   :  { %s271_s21 = smov 8   ;;  %s272_s22 = smov [#allocation2]  }
   0x5   :  { %34 = dma.hbm_to_vmem [thread:$0]  %s27_s14, 2048, %s29_s16, [#allocation6], %s270_s20, %s270_s20, %s271_s21  }
   0x6   :  { %s18_s23 = sshll.u32 %s272_s22, 4  ;;  %s40_s26 = sshll.u32 %s327_s2, 4  ;;  %s19_s23 = int_to_ptr.vmem [resolvable:$true] %s18_s23  ;;  %s41_s26 = int_to_ptr.hbm [resolvable:$true] %s40_s26 }
   0x7   :  { %21 = dma.hbm_to_vmem [thread:$0]  %s17_s19, 128, %s19_s23, [#allocation3]  }
   0x8   :  { %s273_s1 = smov [#allocation7]  }
   0x9   :  { %s42_s27 = sshll.u32 %s273_s1, 4  ;;  %s43_s27 = int_to_ptr.vmem [resolvable:$true] %s42_s27 }
   0xa   :  { %45 = dma.hbm_to_vmem [thread:$0]  %s41_s26, 64, %s43_s27, [#allocation6]  }
   0xb   :  { %263 = dma.done.wait [#allocation3], 128  }
   0xc   :  { %264 = vsyncadd [#allocation3], 4294967168 }
   0xd   :  { %265 = dma.done.wait [#allocation6], 2112  }
   0xe   :  { %266 = vsyncadd [#allocation6], 4294965184  ;;  %vm74_vm0 = vcmask 261120   ;;  %v61_v0 = vld [vmem:[#allocation5 + $0x18] sm:$0xff]  ;;  %v60_v7 = vld [vmem:[#allocation5 + $0x10] sm:$0xff]  ;;  %vm108_vm1 = vcmask 257024  }
   0xf   :  { %v65_v1 = vld [vmem:[#allocation5 + $0x38] sm:$0xff]  ;;  %v96_v4 = vsel %vm74_vm0, %v61_v0, 0.0  ;;  %v64_v8 = vld [vmem:[#allocation5 + $0x30] sm:$0xff]  ;;  %v89_v12 = vsel %vm74_vm0, %v60_v7, 0.0  ;;  %v59_v14 = vld [vmem:[#allocation5 + $0x8] sm:$0xff]  ;;  %s274_s0 = smov [#allocation8]  }
  0x10   :  { %v69_v2 = vld [vmem:[#allocation5 + $0x58] sm:$0xff]  ;;  %v97_v5 = vsel %vm74_vm0, %v65_v1, 0.0  ;;  %v68_v10 = vld [vmem:[#allocation5 + $0x50] sm:$0xff]  ;;  %v90_v13 = vsel %vm74_vm0, %v64_v8, 0.0  ;;  %v63_v18 = vld [vmem:[#allocation5 + $0x28] sm:$0xff]  ;;  %v82_v21 = vsel %vm74_vm0, %v59_v14, 0.0 }
  0x11   :  { %v73_v3 = vld [vmem:[#allocation5 + $0x78] sm:$0xff]  ;;  %v99_v6 = vsel %vm74_vm0, %v69_v2, 0.0  ;;  %v98_v9 = vadd.f32 %v97_v5, %v96_v4  ;;  %v72_v11 = vld [vmem:[#allocation5 + $0x70] sm:$0xff]  ;;  %v91_v16 = vadd.f32 %v90_v13, %v89_v12  ;;  %v92_v17 = vsel %vm74_vm0, %v68_v10, 0.0  ;;  %v67_v19 = vld [vmem:[#allocation5 + $0x48] sm:$0xff]  ;;  %s147_s2 = sshll.u32 %s274_s0, 4  ;;  %s148_s2 = int_to_ptr.vmem [resolvable:$true] %s147_s2 }
  0x12   :  { %v101_v15 = vsel %vm74_vm0, %v73_v3, 0.0  ;;  %v71_v20 = vld [vmem:[#allocation5 + $0x68] sm:$0xff]  ;;  %v94_v23 = vsel %vm74_vm0, %v72_v11, 0.0  ;;  %v83_v24 = vsel %vm74_vm0, %v63_v18, 0.0  ;;  %v85_v25 = vsel %vm74_vm0, %v67_v19, 0.0  ;;  %v58_v26 = vld [vmem:[#allocation5] sm:$0xff] }
  0x13   :  { %v100_v22 = vadd.f32 %v99_v6, %v98_v9  ;;  %v62_v27 = vld [vmem:[#allocation5 + $0x20] sm:$0xff]  ;;  %v93_v29 = vadd.f32 %v92_v17, %v91_v16  ;;  %v84_v30 = vadd.f32 %v83_v24, %v82_v21  ;;  %v75_v32 = vsel %vm74_vm0, %v58_v26, 0.0  ;;  %v117_v48 = vld [vmem:[#allocation2] sm:$0xff]  ;;  %s149_s30 = sshll.u32 %s328_s3, 4  ;;  %s150_s30 = int_to_ptr.hbm [resolvable:$true] %s149_s30 }
  0x14   :  { %v66_v28 = vld [vmem:[#allocation5 + $0x40] sm:$0xff]  ;;  %v76_v33 = vsel %vm74_vm0, %v62_v27, 0.0  ;;  %v87_v35 = vsel %vm74_vm0, %v71_v20, 0.0 }
  0x15   :  { %v70_v31 = vld [vmem:[#allocation5 + $0x60] sm:$0xff]  ;;  %v102_v34 = vadd.f32 %v101_v15, %v100_v22  ;;  %v77_v36 = vadd.f32 %v76_v33, %v75_v32  ;;  %v78_v37 = vsel %vm74_vm0, %v66_v28, 0.0  ;;  %v95_v38 = vadd.f32 %v94_v23, %v93_v29 }
  0x16   :  { %v86_v39 = vadd.f32 %v85_v25, %v84_v30  ;;  %v80_v40 = vsel %vm74_vm0, %v70_v31, 0.0  ;;  %v107_v49 = vld [vmem:[#allocation7] sm:$0xf] }
  0x17   :  { %v106_v41 = vmul.f32 0.25, %v102_v34  ;;  %v79_v42 = vadd.f32 %v78_v37, %v77_v36  ;;  %v105_v43 = vmul.f32 0.25, %v95_v38  ;;  %v109_v50 = vsel %vm108_vm1, %v107_v49, 0.0 }
  0x18   :  { %v88_v44 = vadd.f32 %v87_v35, %v86_v39  ;;  %v110_v51 = vrot.slane %v109_v50, 4 }
  0x19   :  { %133 = vmatpush.msra.mxu0 %v106_v41  ;;  %v81_v45 = vadd.f32 %v80_v40, %v79_v42 }
  0x1a   :  { %v104_v46 = vmul.f32 0.25, %v88_v44  ;;  %v111_v52 = vadd.f32 %v110_v51, %v109_v50 }
  0x1b   :  { %134 = vmatpush.msra.mxu0 %v105_v43  ;;  %v103_v47 = vmul.f32 0.25, %v81_v45 }
  0x1c   :  { %v112_v53 = vrot.slane %v111_v52, 2 }
  0x1d   :  { %135 = vmatpush.msra.mxu0 %v104_v46 }
  0x1e   :  { %v113_v54 = vadd.f32 %v112_v53, %v111_v52 }
  0x1f   :  { %136 = vmatpush.msra.mxu0 %v103_v47 }
  0x20   :  { %160 = vmatmul.msk.f32.vlgmr.msra.gmra.mxu0 %vm74_vm0, %v117_v48  ;;  %v114_v55 = vrot.slane %v113_v54, 1 }
  0x22   :  { %v115_v56 = vadd.f32 %v114_v55, %v113_v54 }
  0x24   :  { %v116_v57 = vmul.f32 0.25, %v115_v56 }
  0x9d   :  { %v138_v58 = vpop.f32.mrf.mxu0 }
  0x9e   :  { %v139_v59 = vadd.f32 %v138_v58, %v116_v57 }
  0xa0   :  { %141 = vst.msk [vmem:[#allocation8] sm:$0xff] %vm74_vm0, %v139_v59 }
  0xa1   :  { %152 = dma.vmem_to_hbm [thread:$0]  %s148_s2, 128, %s150_s30, [#allocation4]  }
  0xa2   :  { %267 = dma.done.wait [#allocation4], 128  }
  0xa3   :  { %268 = vsyncadd [#allocation4], 4294967168 }
  0xa4   :  { %157 = vsyncpa [#allocation3], 1 }
  0xa5   :  { %158 = vsyncpa [#allocation6], 1 }
  0xa6   :  { %159 = vsyncpa [#allocation4], 1 }

</bundles_post_ra>
